<compile_context>
chip_gen: v5e
topology: v5e:2x2
jax: 0.10.0
libtpu: 0.0.40
codegen_flags: <defaults>
</compile_context>

<pallas_src>
import jax
import jax.numpy as jnp
from jax.experimental import pallas as pl
from jax.experimental.pallas import tpu as pltpu

_HIDDEN = 256


def _round_up(n: int, m: int) -> int:
    return ((n + m - 1) // m) * m


def _generator_kernel(x_ref, w1_ref, b1_ref, w2_ref, b2_ref, w3_ref, b3_ref, o_ref):
    """Fused 3-layer MLP on one (TB, F) batch tile.

    Matmul operands are bf16, accumulation / bias / ReLU are f32.
    """
    x = x_ref[...]  # (TB, F) bf16

    h1 = jnp.dot(x, w1_ref[...], preferred_element_type=jnp.float32) + b1_ref[...]
    h1 = jnp.maximum(h1, 0.0)

    h2 = jnp.dot(h1.astype(jnp.bfloat16), w2_ref[...],
                 preferred_element_type=jnp.float32) + b2_ref[...]
    h2 = jnp.maximum(h2, 0.0)

    out = jnp.dot(h2.astype(jnp.bfloat16), w3_ref[...],
                  preferred_element_type=jnp.float32) + b3_ref[...]
    o_ref[...] = out.astype(o_ref.dtype)


def generator_forward(x, params, *, tb: int = 512):
    """Fused MLP forward pass as a single batch-tiled Pallas call.

    x: (B, features); params: dict with w1,b1,w2,b2,w3,b3
       (weights stored as (in_dim, out_dim) bf16, biases as (1, out_dim) f32).
    Returns (B, output_dim) float32.
    """
    w1, b1 = params["w1"], params["b1"]
    w2, b2 = params["w2"], params["b2"]
    w3, b3 = params["w3"], params["b3"]

    B, F = x.shape
    H = w1.shape[1]
    out_dim = w3.shape[1]

    # Adapt the batch tile: never over-pad small batches, keep rows a
    # multiple of 8 (sublane) for larger ones.
    TB = min(tb, _round_up(max(B, 1), 8))
    B_pad = _round_up(max(B, 1), TB)

    # `input.float()` semantics, then bf16 for the MXU / HBM bandwidth.
    # Single-pass cast; pad only when the batch is not a TB multiple.
    xb = x.astype(jnp.bfloat16)
    if B_pad != B:
        xb = jnp.pad(xb, ((0, B_pad - B), (0, 0)))

    w1b = w1.astype(jnp.bfloat16)
    w2b = w2.astype(jnp.bfloat16)
    w3b = w3.astype(jnp.bfloat16)
    b1f = b1.astype(jnp.float32)
    b2f = b2.astype(jnp.float32)
    b3f = b3.astype(jnp.float32)

    grid = (B_pad // TB,)

    # Weights/biases: constant index map -> DMA'd once, VMEM-resident.
    def resident(shape):
        return pl.BlockSpec(shape, lambda i: (0,) * len(shape))

    flops = 2 * B_pad * (F * H + H * H + H * out_dim)
    bytes_accessed = (
        xb.size * 2
        + (w1b.size + w2b.size + w3b.size) * 2
        + (b1f.size + b2f.size + b3f.size) * 4
        + B_pad * out_dim * 4
    )

    out = pl.pallas_call(
        _generator_kernel,
        out_shape=jax.ShapeDtypeStruct((B_pad, out_dim), jnp.float32),
        grid=grid,
        in_specs=[
            pl.BlockSpec((TB, F), lambda i: (i, 0)),   # batch-tiled input, no F pad
            resident(w1b.shape), resident(b1f.shape),
            resident(w2b.shape), resident(b2f.shape),
            resident(w3b.shape), resident(b3f.shape),
        ],
        out_specs=pl.BlockSpec((TB, out_dim), lambda i: (i, 0)),
        compiler_params=pltpu.CompilerParams(
            dimension_semantics=("parallel",),  # shard batch tiles across TCs (v7x)
        ),
        cost_estimate=pl.CostEstimate(
            flops=flops, transcendentals=0, bytes_accessed=bytes_accessed),
    )(xb, w1b, b1f, w2b, b2f, w3b, b3f)

    if B_pad != B:
        out = out[:B]
    return out


def init_generator_params(key, features: int, output_dim: int):
    """Deterministic init mimicking nn.Linear default (uniform +-1/sqrt(fan_in)).

    Weights are stored as (in_dim, out_dim) bf16 (kernel storage format);
    biases as (1, out_dim) f32.
    """
    keys = jax.random.split(key, 6)

    def linear(kw, kb, fan_in, fan_out):
        bound = 1.0 / jnp.sqrt(float(fan_in))
        w = jax.random.uniform(kw, (fan_in, fan_out), jnp.float32, -bound, bound)
        b = jax.random.uniform(kb, (1, fan_out), jnp.float32, -bound, bound)
        return w.astype(jnp.bfloat16), b

    w1, b1 = linear(keys[0], keys[1], features, _HIDDEN)
    w2, b2 = linear(keys[2], keys[3], _HIDDEN, _HIDDEN)
    w3, b3 = linear(keys[4], keys[5], _HIDDEN, output_dim)
    return {"w1": w1, "b1": b1, "w2": w2, "b2": b2, "w3": w3, "b3": b3}


def _reference_forward(x, p):
    """Pure-JAX reference mirroring the kernel's bf16-operand / f32-acc math."""
    xb = x.astype(jnp.bfloat16)
    w1 = p["w1"].astype(jnp.bfloat16)
    w2 = p["w2"].astype(jnp.bfloat16)
    w3 = p["w3"].astype(jnp.bfloat16)
    h1 = jnp.maximum(
        jnp.dot(xb, w1, preferred_element_type=jnp.float32)
        + p["b1"].astype(jnp.float32), 0.0)
    h2 = jnp.maximum(
        jnp.dot(h1.astype(jnp.bfloat16), w2, preferred_element_type=jnp.float32)
        + p["b2"].astype(jnp.float32), 0.0)
    return (jnp.dot(h2.astype(jnp.bfloat16), w3, preferred_element_type=jnp.float32)
            + p["b3"].astype(jnp.float32))


if __name__ == "__main__":
    key = jax.random.PRNGKey(0)
    k_param, k_x = jax.random.split(key)

    batch = 8
    features = 32
    output_dim = 16

    params = init_generator_params(k_param, features, output_dim)
    x = jax.random.normal(k_x, (batch, features), jnp.float32)

    out = generator_forward(x, params)
    out = jax.block_until_ready(out)

    ref = _reference_forward(x, params)
    assert out.shape == (batch, output_dim)
    # Kernel and reference use identical bf16-operand / f32-accumulate math;
    # only accumulation-order differences remain. (Deviation from a pure-f32
    # PyTorch Generator is bounded by bf16 weight/input rounding by design.)
    assert jnp.allclose(out, ref, atol=1e-3, rtol=1e-3)

    print("KERNEL_OK")
</pallas_src>

<mosaic_0001>
module attributes {stable_mosaic.version = 11 : i64} {
  func.func @_generator_kernel(%arg0: i32, %arg1: memref<8x32xbf16, #tpu.memory_space<vmem>>, %arg2: memref<32x256xbf16, #tpu.memory_space<vmem>>, %arg3: memref<1x256xf32, #tpu.memory_space<vmem>>, %arg4: memref<256x256xbf16, #tpu.memory_space<vmem>>, %arg5: memref<1x256xf32, #tpu.memory_space<vmem>>, %arg6: memref<256x16xbf16, #tpu.memory_space<vmem>>, %arg7: memref<1x16xf32, #tpu.memory_space<vmem>>, %arg8: memref<8x16xf32, #tpu.memory_space<vmem>>) attributes {dimension_semantics = [#tpu.dimension_semantics<parallel>], iteration_bounds = array<i64: 1>, scalar_prefetch = 0 : i64, scratch_operands = 0 : i64, tpu.core_type = #tpu.core_type<tc>, window_params = [{transform_indices = @transform_0, window_bounds = array<i64: 8, 32>}, {pipeline_mode = #tpu.pipeline_mode<synchronous>, transform_indices = @transform_1, window_bounds = array<i64: 32, 256>}, {pipeline_mode = #tpu.pipeline_mode<synchronous>, transform_indices = @transform_2, window_bounds = array<i64: 1, 256>}, {pipeline_mode = #tpu.pipeline_mode<synchronous>, transform_indices = @transform_3, window_bounds = array<i64: 256, 256>}, {pipeline_mode = #tpu.pipeline_mode<synchronous>, transform_indices = @transform_4, window_bounds = array<i64: 1, 256>}, {pipeline_mode = #tpu.pipeline_mode<synchronous>, transform_indices = @transform_5, window_bounds = array<i64: 256, 16>}, {pipeline_mode = #tpu.pipeline_mode<synchronous>, transform_indices = @transform_6, window_bounds = array<i64: 1, 16>}, {transform_indices = @transform_7, window_bounds = array<i64: 8, 16>}]} {
    %c0 = arith.constant 0 : index
    %c0_0 = arith.constant 0 : index
    %0 = vector.load %arg1[%c0, %c0_0] : memref<8x32xbf16, #tpu.memory_space<vmem>>, vector<8x32xbf16>
    %c0_1 = arith.constant 0 : index
    %c0_2 = arith.constant 0 : index
    %1 = vector.load %arg2[%c0_1, %c0_2] : memref<32x256xbf16, #tpu.memory_space<vmem>>, vector<32x256xbf16>
    %cst = arith.constant dense<0.000000e+00> : vector<8x256xf32>
    %2 = tpu.matmul %0, %1, %cst {dimension_numbers = #tpu.dot_dimension_numbers<[1], [0], [0], [1], [0, 0, 1, 1], [], []>} : vector<8x32xbf16>, vector<32x256xbf16>, vector<8x256xf32> -> vector<8x256xf32>
    %c0_3 = arith.constant 0 : index
    %c0_4 = arith.constant 0 : index
    %3 = vector.load %arg3[%c0_3, %c0_4] : memref<1x256xf32, #tpu.memory_space<vmem>>, vector<1x256xf32>
    %4 = vector.broadcast %3 : vector<1x256xf32> to vector<8x256xf32>
    %5 = arith.addf %2, %4 : vector<8x256xf32>
    %cst_5 = arith.constant 0.000000e+00 : f32
    %6 = vector.broadcast %cst_5 : f32 to vector<8x256xf32>
    %7 = arith.maximumf %5, %6 : vector<8x256xf32>
    %8 = arith.truncf %7 : vector<8x256xf32> to vector<8x256xbf16>
    %c0_6 = arith.constant 0 : index
    %c0_7 = arith.constant 0 : index
    %9 = vector.load %arg4[%c0_6, %c0_7] : memref<256x256xbf16, #tpu.memory_space<vmem>>, vector<256x256xbf16>
    %cst_8 = arith.constant dense<0.000000e+00> : vector<8x256xf32>
    %10 = tpu.matmul %8, %9, %cst_8 {dimension_numbers = #tpu.dot_dimension_numbers<[1], [0], [0], [1], [0, 0, 1, 1], [], []>} : vector<8x256xbf16>, vector<256x256xbf16>, vector<8x256xf32> -> vector<8x256xf32>
    %c0_9 = arith.constant 0 : index
    %c0_10 = arith.constant 0 : index
    %11 = vector.load %arg5[%c0_9, %c0_10] : memref<1x256xf32, #tpu.memory_space<vmem>>, vector<1x256xf32>
    %12 = vector.broadcast %11 : vector<1x256xf32> to vector<8x256xf32>
    %13 = arith.addf %10, %12 : vector<8x256xf32>
    %cst_11 = arith.constant 0.000000e+00 : f32
    %14 = vector.broadcast %cst_11 : f32 to vector<8x256xf32>
    %15 = arith.maximumf %13, %14 : vector<8x256xf32>
    %16 = arith.truncf %15 : vector<8x256xf32> to vector<8x256xbf16>
    %c0_12 = arith.constant 0 : index
    %c0_13 = arith.constant 0 : index
    %17 = vector.load %arg6[%c0_12, %c0_13] : memref<256x16xbf16, #tpu.memory_space<vmem>>, vector<256x16xbf16>
    %cst_14 = arith.constant dense<0.000000e+00> : vector<8x16xf32>
    %18 = tpu.matmul %16, %17, %cst_14 {dimension_numbers = #tpu.dot_dimension_numbers<[1], [0], [0], [1], [0, 0, 1, 1], [], []>} : vector<8x256xbf16>, vector<256x16xbf16>, vector<8x16xf32> -> vector<8x16xf32>
    %c0_15 = arith.constant 0 : index
    %c0_16 = arith.constant 0 : index
    %19 = vector.load %arg7[%c0_15, %c0_16] : memref<1x16xf32, #tpu.memory_space<vmem>>, vector<1x16xf32>
    %20 = vector.broadcast %19 : vector<1x16xf32> to vector<8x16xf32>
    %21 = arith.addf %18, %20 : vector<8x16xf32>
    %c0_17 = arith.constant 0 : index
    %c0_18 = arith.constant 0 : index
    %22 = vector.load %arg8[%c0_17, %c0_18] : memref<8x16xf32, #tpu.memory_space<vmem>>, vector<8x16xf32>
    tpu.vector_store %arg8[%c0_17, %c0_18], %21 {strides = array<i32>} : memref<8x16xf32, #tpu.memory_space<vmem>>, vector<8x16xf32>,
    return
  }
  func.func @transform_0(%arg0: i32) -> (i32, i32) {
    %c0_i32 = arith.constant 0 : i32
    %c0_i32_0 = arith.constant 0 : i32
    return %arg0, %c0_i32 : i32, i32
  }
  func.func @transform_1(%arg0: i32) -> (i32, i32) {
    %c0_i32 = arith.constant 0 : i32
    %c0_i32_0 = arith.constant 0 : i32
    %c0_i32_1 = arith.constant 0 : i32
    return %c0_i32, %c0_i32_0 : i32, i32
  }
  func.func @transform_2(%arg0: i32) -> (i32, i32) {
    %c0_i32 = arith.constant 0 : i32
    %c0_i32_0 = arith.constant 0 : i32
    %c0_i32_1 = arith.constant 0 : i32
    return %c0_i32, %c0_i32_0 : i32, i32
  }
  func.func @transform_3(%arg0: i32) -> (i32, i32) {
    %c0_i32 = arith.constant 0 : i32
    %c0_i32_0 = arith.constant 0 : i32
    %c0_i32_1 = arith.constant 0 : i32
    return %c0_i32, %c0_i32_0 : i32, i32
  }
  func.func @transform_4(%arg0: i32) -> (i32, i32) {
    %c0_i32 = arith.constant 0 : i32
    %c0_i32_0 = arith.constant 0 : i32
    %c0_i32_1 = arith.constant 0 : i32
    return %c0_i32, %c0_i32_0 : i32, i32
  }
  func.func @transform_5(%arg0: i32) -> (i32, i32) {
    %c0_i32 = arith.constant 0 : i32
    %c0_i32_0 = arith.constant 0 : i32
    %c0_i32_1 = arith.constant 0 : i32
    return %c0_i32, %c0_i32_0 : i32, i32
  }
  func.func @transform_6(%arg0: i32) -> (i32, i32) {
    %c0_i32 = arith.constant 0 : i32
    %c0_i32_0 = arith.constant 0 : i32
    %c0_i32_1 = arith.constant 0 : i32
    return %c0_i32, %c0_i32_0 : i32, i32
  }
  func.func @transform_7(%arg0: i32) -> (i32, i32) {
    %c0_i32 = arith.constant 0 : i32
    %c0_i32_0 = arith.constant 0 : i32
    return %arg0, %c0_i32 : i32, i32
  }
}

</mosaic_0001>

<bundles_post_ra>
// kernel: tpu_custom_call.1
= control target key start
LH: loop header
LB: loop body
LE: loop exit
PB: predicated region body
PF: predicated region fallthrough
CT: control target
= control target key end

     0   :  { %12 = vsyncpa [#allocation3], 0  ;;  %s995_s0 = inlined_call_operand.vmem [shape: bf16[8,32], index: 0, kind: input, shape index: {}]   ;;  %s996_s1 = inlined_call_operand.vmem [shape: bf16[32,256], index: 1, kind: input, shape index: {}]   ;;  %s997_s2 = inlined_call_operand.vmem [shape: f32[1,256], index: 2, kind: input, shape index: {}]   ;;  %s998_s3 = inlined_call_operand.hbm [shape: bf16[256,256], index: 3, kind: input, shape index: {}]   ;;  %s999_s4 = inlined_call_operand.vmem [shape: f32[1,256], index: 4, kind: input, shape index: {}]   ;;  %s1000_s5 = inlined_call_operand.vmem [shape: bf16[256,16], index: 5, kind: input, shape index: {}]   ;;  %s1001_s6 = inlined_call_operand.vmem [shape: f32[1,16], index: 6, kind: input, shape index: {}]   ;;  %s1002_s7 = inlined_call_operand.hbm [shape: f32[8,16], index: 7, kind: output, shape index: {}]  }
   0x1   :  { %13 = vsyncpa [#allocation4], 0  ;;  %s24_s26 = sshll.u32 %s998_s3, 4  ;;  %s859_s27 = smov [#allocation2]   ;;  %s25_s26 = int_to_ptr.hbm [resolvable:$true] %s24_s26 }
   0x2   :  { %s26_s28 = sshll.u32 %s859_s27, 4  ;;  %s860_s29 = smov 128   ;;  %s27_s28 = int_to_ptr.vmem [resolvable:$true] %s26_s28 }
   0x3   :  { %s861_s30 = smov 8  }
   0x4   :  { %32 = dma.hbm_to_vmem [thread:$0]  %s25_s26, 4096, %s27_s28, [#allocation3], %s860_s29, %s860_s29, %s861_s30  }
   0x5   :  { %855 = dma.done.wait [#allocation3], 4096  }
   0x6   :  { %856 = vsyncadd [#allocation3], 4294963200  ;;  %v550_v0 = vld [vmem:[%s996_s1 + $0x10] sm:$0xf]  ;;  %v753_v1 = vld [vmem:[%s996_s1 + $0x14] sm:$0xf0] }
   0x7   :  { %v752_v2 = vld [vmem:[%s996_s1 + $0x14] sm:$0xf]  ;;  %v551_v3 = vor.u32 %v753_v1, %v550_v0  ;;  %v552_v4 = vld [vmem:[%s996_s1 + $0x18] sm:$0xf0]  ;;  %v542_v5 = vld [vmem:[%s996_s1] sm:$0xf] }
   0x8   :  { %v751_v6 = vld [vmem:[%s996_s1 + $0x4] sm:$0xf0]  ;;  %v555_v7 = vor.u32 %v752_v2, %v552_v4  ;;  %v750_v8 = vld [vmem:[%s996_s1 + $0x4] sm:$0xf]  ;;  %v544_v9 = vld [vmem:[%s996_s1 + $0x8] sm:$0xf0] }
   0x9   :  { %vm75_vm0 = vcmask 261120   ;;  %85 = vmatpush.bf16.msra.mxu0 %v551_v3  ;;  %v543_v10 = vor.u32 %v751_v6, %v542_v5  ;;  %v616_v11 = vld [vmem:[#allocation2 + $0x70] sm:$0xf]  ;;  %v769_v12 = vld [vmem:[#allocation2 + $0x74] sm:$0xf0]  ;;  %v547_v14 = vor.u32 %v750_v8, %v544_v9  ;;  %s862_s9 = smov [#allocation5]  }
   0xa   :  { %v680_v13 = vld [vmem:[#allocation2 + $0xf0] sm:$0xf]  ;;  %98 = vmatpush.bf16.msra.mxu1 %v555_v7  ;;  %v617_v15 = vor.u32 %v769_v12, %v616_v11  ;;  %v785_v16 = vld [vmem:[#allocation2 + $0xf4] sm:$0xf0]  ;;  %v768_v17 = vld [vmem:[#allocation2 + $0x74] sm:$0xf] }
   0xb   :  { %v618_v18 = vld [vmem:[#allocation2 + $0x78] sm:$0xf0]  ;;  %v44_v19 = vld [vmem:[%s995_s0] sm:$0xf]  ;;  %v681_v20 = vor.u32 %v785_v16, %v680_v13  ;;  %v784_v22 = vld [vmem:[#allocation2 + $0xf4] sm:$0xf] }
   0xc   :  { %v621_v21 = vor.u32 %v768_v17, %v618_v18  ;;  %v682_v23 = vld [vmem:[#allocation2 + $0xf8] sm:$0xf0]  ;;  %v608_v24 = vld [vmem:[#allocation2 + $0x60] sm:$0xf]  ;;  %307 = vmatpush.bf16.msra.mxu2 %v617_v15  ;;  %v767_v26 = vld [vmem:[#allocation2 + $0x64] sm:$0xf0] }
   0xd   :  { %v685_v25 = vor.u32 %v784_v22, %v682_v23  ;;  %v672_v27 = vld [vmem:[#allocation2 + $0xe0] sm:$0xf]  ;;  %v783_v28 = vld [vmem:[#allocation2 + $0xe4] sm:$0xf0]  ;;  %86 = vmatpush.bf16.msra.mxu0 %v543_v10  ;;  %320 = vmatpush.bf16.msra.mxu3 %v681_v20  ;;  %v609_v29 = vor.u32 %v767_v26, %v608_v24  ;;  %v766_v31 = vld [vmem:[#allocation2 + $0x64] sm:$0xf] }
   0xe   :  { %v673_v30 = vor.u32 %v783_v28, %v672_v27  ;;  %v610_v32 = vld [vmem:[#allocation2 + $0x68] sm:$0xf0]  ;;  %v782_v33 = vld [vmem:[#allocation2 + $0xe4] sm:$0xf]  ;;  %99 = vmatpush.bf16.msra.mxu1 %v547_v14  ;;  %v600_v36 = vld [vmem:[#allocation2 + $0x50] sm:$0xf] }
   0xf   :  { %v613_v34 = vor.u32 %v766_v31, %v610_v32  ;;  %v674_v35 = vld [vmem:[#allocation2 + $0xe8] sm:$0xf0]  ;;  %v765_v37 = vld [vmem:[#allocation2 + $0x54] sm:$0xf0]  ;;  %v664_v39 = vld [vmem:[#allocation2 + $0xd0] sm:$0xf] }
  0x10   :  { %v677_v38 = vor.u32 %v782_v33, %v674_v35  ;;  %v781_v40 = vld [vmem:[#allocation2 + $0xd4] sm:$0xf0]  ;;  %v764_v41 = vld [vmem:[#allocation2 + $0x54] sm:$0xf]  ;;  %556 = vmatmul.msk.bf16.vlgmr.msra.gmra.mxu0 %vm75_vm0, %v44_v19  ;;  %308 = vmatpush.bf16.msra.mxu2 %v609_v29  ;;  %v601_v42 = vor.u32 %v765_v37, %v600_v36  ;;  %v602_v43 = vld [vmem:[#allocation2 + $0x58] sm:$0xf0] }
  0x11   :  { %333 = vmatpush.bf16.msrb.mxu0 %v621_v21  ;;  %v780_v44 = vld [vmem:[#allocation2 + $0xd4] sm:$0xf]  ;;  %v666_v45 = vld [vmem:[#allocation2 + $0xd8] sm:$0xf0]  ;;  %557 = vmatmul.msk.bf16.vlgmr.msra.gmra.mxu1 %vm75_vm0, %v44_v19  ;;  %v665_v46 = vor.u32 %v781_v40, %v664_v39  ;;  %v592_v47 = vld [vmem:[#allocation2 + $0x40] sm:$0xf]  ;;  %v605_v49 = vor.u32 %v764_v41, %v602_v43 }
  0x12   :  { %346 = vmatpush.bf16.msrb.mxu1 %v685_v25  ;;  %321 = vmatpush.bf16.msra.mxu3 %v673_v30  ;;  %v763_v48 = vld [vmem:[#allocation2 + $0x44] sm:$0xf0]  ;;  %v656_v50 = vld [vmem:[#allocation2 + $0xc0] sm:$0xf]  ;;  %v669_v52 = vor.u32 %v780_v44, %v666_v45  ;;  %v762_v53 = vld [vmem:[#allocation2 + $0x44] sm:$0xf] }
  0x13   :  { %v779_v51 = vld [vmem:[#allocation2 + $0xc4] sm:$0xf0]  ;;  %v594_v54 = vld [vmem:[#allocation2 + $0x48] sm:$0xf0]  ;;  %v593_v55 = vor.u32 %v763_v48, %v592_v47  ;;  %v778_v56 = vld [vmem:[#allocation2 + $0xc4] sm:$0xf] }
  0x14   :  { %309 = vmatpush.bf16.msra.mxu2 %v601_v42  ;;  %v658_v57 = vld [vmem:[#allocation2 + $0xc8] sm:$0xf0]  ;;  %v657_v58 = vor.u32 %v779_v51, %v656_v50  ;;  %v584_v59 = vld [vmem:[#allocation2 + $0x30] sm:$0xf]  ;;  %v761_v60 = vld [vmem:[#allocation2 + $0x34] sm:$0xf0]  ;;  %v597_v61 = vor.u32 %v762_v53, %v594_v54 }
  0x15   :  { %334 = vmatpush.bf16.msrb.mxu0 %v613_v34  ;;  %v648_v62 = vld [vmem:[#allocation2 + $0xb0] sm:$0xf]  ;;  %v777_v63 = vld [vmem:[#allocation2 + $0xb4] sm:$0xf0]  ;;  %v661_v0 = vor.u32 %v778_v56, %v658_v57  ;;  %v760_v1 = vld [vmem:[#allocation2 + $0x34] sm:$0xf]  ;;  %v585_v3 = vor.u32 %v761_v60, %v584_v59 }
  0x16   :  { %347 = vmatpush.bf16.msrb.mxu1 %v677_v38  ;;  %322 = vmatpush.bf16.msra.mxu3 %v665_v46  ;;  %v586_v2 = vld [vmem:[#allocation2 + $0x38] sm:$0xf0]  ;;  %v776_v4 = vld [vmem:[#allocation2 + $0xb4] sm:$0xf]  ;;  %v649_v6 = vor.u32 %v777_v63, %v648_v62  ;;  %v576_v7 = vld [vmem:[#allocation2 + $0x20] sm:$0xf] }
  0x17   :  { %v650_v5 = vld [vmem:[#allocation2 + $0xb8] sm:$0xf0]  ;;  %v759_v8 = vld [vmem:[#allocation2 + $0x24] sm:$0xf0]  ;;  %v589_v9 = vor.u32 %v760_v1, %v586_v2  ;;  %v640_v10 = vld [vmem:[#allocation2 + $0xa0] sm:$0xf] }
  0x18   :  { %310 = vmatpush.bf16.msra.mxu2 %v593_v55  ;;  %v775_v11 = vld [vmem:[#allocation2 + $0xa4] sm:$0xf0]  ;;  %v653_v12 = vor.u32 %v776_v4, %v650_v5  ;;  %v758_v13 = vld [vmem:[#allocation2 + $0x24] sm:$0xf]  ;;  %v578_v14 = vld [vmem:[#allocation2 + $0x28] sm:$0xf0]  ;;  %v577_v15 = vor.u32 %v759_v8, %v576_v7 }
  0x19   :  { %335 = vmatpush.bf16.msrb.mxu0 %v605_v49  ;;  %v774_v16 = vld [vmem:[#allocation2 + $0xa4] sm:$0xf]  ;;  %v642_v17 = vld [vmem:[#allocation2 + $0xa8] sm:$0xf0]  ;;  %v641_v18 = vor.u32 %v775_v11, %v640_v10  ;;  %v581_v19 = vor.u32 %v758_v13, %v578_v14  ;;  %v568_v21 = vld [vmem:[#allocation2 + $0x10] sm:$0xf] }
  0x1a   :  { %348 = vmatpush.bf16.msrb.mxu1 %v669_v52  ;;  %323 = vmatpush.bf16.msra.mxu3 %v657_v58  ;;  %v645_v20 = vor.u32 %v774_v16, %v642_v17  ;;  %v757_v22 = vld [vmem:[#allocation2 + $0x14] sm:$0xf0]  ;;  %v632_v23 = vld [vmem:[#allocation2 + $0x90] sm:$0xf]  ;;  %v756_v26 = vld [vmem:[#allocation2 + $0x14] sm:$0xf] }
  0x1b   :  { %v569_v24 = vor.u32 %v757_v22, %v568_v21  ;;  %v773_v25 = vld [vmem:[#allocation2 + $0x94] sm:$0xf0]  ;;  %v570_v27 = vld [vmem:[#allocation2 + $0x18] sm:$0xf0]  ;;  %v772_v30 = vld [vmem:[#allocation2 + $0x94] sm:$0xf] }
  0x1c   :  { %311 = vmatpush.bf16.msra.mxu2 %v585_v3  ;;  %v633_v28 = vor.u32 %v773_v25, %v632_v23  ;;  %v573_v29 = vor.u32 %v756_v26, %v570_v27  ;;  %v634_v31 = vld [vmem:[#allocation2 + $0x98] sm:$0xf0]  ;;  %v560_v33 = vld [vmem:[#allocation2] sm:$0xf]  ;;  %v755_v34 = vld [vmem:[#allocation2 + $0x4] sm:$0xf0] }
  0x1d   :  { %336 = vmatpush.bf16.msrb.mxu0 %v597_v61  ;;  %v637_v32 = vor.u32 %v772_v30, %v634_v31  ;;  %v624_v35 = vld [vmem:[#allocation2 + $0x80] sm:$0xf]  ;;  %v561_v36 = vor.u32 %v755_v34, %v560_v33  ;;  %v771_v37 = vld [vmem:[#allocation2 + $0x84] sm:$0xf0]  ;;  %v754_v38 = vld [vmem:[#allocation2 + $0x4] sm:$0xf] }
  0x1e   :  { %349 = vmatpush.bf16.msrb.mxu1 %v661_v0  ;;  %324 = vmatpush.bf16.msra.mxu3 %v649_v6  ;;  %v562_v39 = vld [vmem:[#allocation2 + $0x8] sm:$0xf0]  ;;  %v625_v40 = vor.u32 %v771_v37, %v624_v35  ;;  %v770_v42 = vld [vmem:[#allocation2 + $0x84] sm:$0xf]  ;;  %v801_v45 = vld [vmem:[%s1000_s5 + $0x78] sm:$0xff]  ;;  %s528_s10 = sshll.u32 %s862_s9, 4  ;;  %s529_s10 = int_to_ptr.vmem [resolvable:$true] %s528_s10 }
  0x1f   :  { %v565_v41 = vor.u32 %v754_v38, %v562_v39  ;;  %v626_v43 = vld [vmem:[#allocation2 + $0x88] sm:$0xf0]  ;;  %v793_v46 = vld [vmem:[%s1000_s5 + $0x38] sm:$0xff]  ;;  %v800_v47 = vld [vmem:[%s1000_s5 + $0x70] sm:$0xff]  ;;  %s530_s13 = sshll.u32 %s1002_s7, 4  ;;  %vm521_vm1 = vcmask 130048   ;;  %s531_s13 = int_to_ptr.hbm [resolvable:$true] %s530_s13 }
  0x20   :  { %312 = vmatpush.bf16.msra.mxu2 %v577_v15  ;;  %v629_v44 = vor.u32 %v770_v42, %v626_v43  ;;  %v792_v48 = vld [vmem:[%s1000_s5 + $0x30] sm:$0xff]  ;;  %v799_v49 = vld [vmem:[%s1000_s5 + $0x68] sm:$0xff]  ;;  %v798_v51 = vld [vmem:[%s1000_s5 + $0x60] sm:$0xff] }
  0x21   :  { %337 = vmatpush.bf16.msrb.mxu0 %v589_v9  ;;  %v791_v50 = vld [vmem:[%s1000_s5 + $0x28] sm:$0xff]  ;;  %v790_v52 = vld [vmem:[%s1000_s5 + $0x20] sm:$0xff]  ;;  %v797_v53 = vld [vmem:[%s1000_s5 + $0x58] sm:$0xff] }
  0x22   :  { %350 = vmatpush.bf16.msrb.mxu1 %v653_v12  ;;  %325 = vmatpush.bf16.msra.mxu3 %v641_v18  ;;  %v49_v54 = vld [vmem:[%s997_s2] sm:$0x3]  ;;  %v796_v55 = vld [vmem:[%s1000_s5 + $0x50] sm:$0xff]  ;;  %v789_v4 = vld [vmem:[%s1000_s5 + $0x18] sm:$0xff] }
  0x23   :  { %v51_v56 = vperm.slane %v49_v54, 0  ;;  %v52_v57 = vperm.slane %v49_v54, 1  ;;  %v795_v5 = vld [vmem:[%s1000_s5 + $0x48] sm:$0xff]  ;;  %v788_v6 = vld [vmem:[%s1000_s5 + $0x10] sm:$0xff]  ;;  %v794_v7 = vld [vmem:[%s1000_s5 + $0x40] sm:$0xff] }
  0x24   :  { %313 = vmatpush.bf16.msra.mxu2 %v569_v24  ;;  %v787_v8 = vld [vmem:[%s1000_s5 + $0x8] sm:$0xff]  ;;  %v786_v9 = vld [vmem:[%s1000_s5] sm:$0xff] }
  0x25   :  { %338 = vmatpush.bf16.msrb.mxu0 %v581_v19  ;;  %v141_v10 = vld [vmem:[%s999_s4] sm:$0x3] }
  0x26   :  { %351 = vmatpush.bf16.msrb.mxu1 %v645_v20  ;;  %326 = vmatpush.bf16.msra.mxu3 %v633_v28  ;;  %v144_v11 = vperm.slane %v141_v10, 1  ;;  %v143_v16 = vperm.slane %v141_v10, 0  ;;  %v806_v30 = vld [vmem:[%s1001_s6] ss:$0 sm:$0xff] }
  0x28   :  { %314 = vmatpush.bf16.msra.mxu2 %v561_v36 }
  0x29   :  { %339 = vmatpush.bf16.msrb.mxu0 %v573_v29 }
  0x2a   :  { %352 = vmatpush.bf16.msrb.mxu1 %v637_v32  ;;  %327 = vmatpush.bf16.msra.mxu3 %v625_v40 }
  0x2c   :  { %495 = vmatpush.bf16.msrb.mxu2 %v793_v46 }
  0x2d   :  { %340 = vmatpush.bf16.msrb.mxu0 %v565_v41 }
  0x2e   :  { %353 = vmatpush.bf16.msrb.mxu1 %v629_v44  ;;  %508 = vmatpush.bf16.msrb.mxu3 %v801_v45 }
  0x30   :  { %496 = vmatpush.bf16.msrb.mxu2 %v792_v48 }
  0x32   :  { %509 = vmatpush.bf16.msrb.mxu3 %v800_v47 }
  0x34   :  { %497 = vmatpush.bf16.msrb.mxu2 %v791_v50 }
  0x36   :  { %510 = vmatpush.bf16.msrb.mxu3 %v799_v49 }
  0x38   :  { %498 = vmatpush.bf16.msrb.mxu2 %v790_v52 }
  0x3a   :  { %511 = vmatpush.bf16.msrb.mxu3 %v798_v51 }
  0x3c   :  { %499 = vmatpush.bf16.msrb.mxu2 %v789_v4 }
  0x3e   :  { %512 = vmatpush.bf16.msrb.mxu3 %v797_v53 }
  0x40   :  { %500 = vmatpush.bf16.msrb.mxu2 %v788_v6 }
  0x42   :  { %513 = vmatpush.bf16.msrb.mxu3 %v796_v55 }
  0x44   :  { %501 = vmatpush.bf16.msrb.mxu2 %v787_v8 }
  0x46   :  { %514 = vmatpush.bf16.msrb.mxu3 %v795_v5 }
  0x48   :  { %502 = vmatpush.bf16.msrb.mxu2 %v786_v9 }
  0x4a   :  { %515 = vmatpush.bf16.msrb.mxu3 %v794_v7 }
  0x8d   :  { %v88_v58 = vpop.f32.mrf.mxu0 }
  0x8e   :  { %v89_v59 = vadd.f32 %v88_v58, %v51_v56  ;;  %v101_v60 = vpop.f32.mrf.mxu1 }
  0x8f   :  { %v102_v61 = vadd.f32 %v101_v60, %v52_v57 }
  0x90   :  { %v105_v62 = vmax.f32 %v89_v59, 0.0 }
  0x91   :  { %v106_v63 = vmax.f32 %v102_v61, 0.0 }
  0x92   :  { %v107_v0 = vpack.c.bf16 %v105_v62, %v105_v62 }
  0x93   :  { %v108_v1 = vpack.c.bf16 %v106_v63, %v106_v63 }
  0x94   :  { %315 = vmatmul.bf16.vlgmr.msra.gmra.mxu2 %v107_v0  ;;  %341 = vmatmul.bf16.vlgmr.msrb.gmra.mxu0 %v107_v0 }
  0x95   :  { %328 = vmatmul.bf16.vlgmr.msra.gmra.mxu3 %v108_v1  ;;  %354 = vmatmul.bf16.vlgmr.msrb.gmra.mxu1 %v108_v1  ;;  %v90_v2 = vpop.f32.mrf.mxu0 }
  0x96   :  { %v103_v3 = vpop.f32.mrf.mxu1 }
 0x111   :  { %v342_v12 = vpop.f32.mrf.mxu0 }
 0x112   :  { %v343_v13 = vadd.f32 %v342_v12, %v144_v11  ;;  %v355_v14 = vpop.f32.mrf.mxu1 }
 0x114   :  { %v356_v15 = vadd.f32 %v355_v14, %v343_v13 }
 0x116   :  { %v360_v17 = vmax.f32 %v356_v15, 0.0 }
 0x117   :  { %v316_v18 = vpop.f32.mrf.mxu2 }
 0x118   :  { %v362_v19 = vpack.c.bf16 %v360_v17, %v360_v17  ;;  %v317_v20 = vadd.f32 %v316_v18, %v143_v16  ;;  %v329_v21 = vpop.f32.mrf.mxu3 }
 0x119   :  { %v344_v22 = vpop.f32.mrf.mxu0 }
 0x11a   :  { %v330_v23 = vadd.f32 %v329_v21, %v317_v20  ;;  %v357_v24 = vpop.f32.mrf.mxu1  ;;  %516 = vmatmul.bf16.vlgmr.msrb.gmra.mxu3 %v362_v19 }
 0x11c   :  { %v359_v25 = vmax.f32 %v330_v23, 0.0 }
 0x11e   :  { %v361_v26 = vpack.c.bf16 %v359_v25, %v359_v25 }
 0x11f   :  { %v318_v27 = vpop.f32.mrf.mxu2 }
 0x120   :  { %v331_v28 = vpop.f32.mrf.mxu3  ;;  %503 = vmatmul.bf16.vlgmr.msrb.gmra.mxu2 %v361_v26 }
 0x19d   :  { %v517_v29 = vpop.f32.mrf.mxu3 }
 0x1a3   :  { %v504_v31 = vpop.f32.mrf.mxu2 }
 0x1a4   :  { %v505_v32 = vadd.f32 %v806_v30, %v504_v31 }
 0x1a5   :  { %v519_v33 = vpop.f32.mrf.mxu3 }
 0x1a6   :  { %v518_v34 = vadd.f32 %v517_v29, %v505_v32 }
 0x1a8   :  { %522 = vst.msk [vmem:[#allocation5] sm:$0xff] %vm521_vm1, %v518_v34 }
 0x1a9   :  { %533 = dma.vmem_to_hbm [thread:$0]  %s529_s10, 128, %s531_s13, [#allocation4]  }
 0x1ab   :  { %v506_v35 = vpop.f32.mrf.mxu2 }
 0x1ac   :  { %857 = dma.done.wait [#allocation4], 128  }
 0x1ad   :  { %858 = vsyncadd [#allocation4], 4294967168 }
 0x1ae   :  { %538 = vsyncpa [#allocation3], 1 }
 0x1af   :  { %539 = vsyncpa [#allocation4], 1 }

</bundles_post_ra>
